<compile_context>
chip_gen: v7x
topology: tpu7x:2x2x1
jax: 0.10.0
libtpu: 0.0.40
codegen_flags: <defaults>
</compile_context>

<pallas_src>
import functools
import math

import numpy as np
import jax
import jax.numpy as jnp
from jax.experimental import pallas as pl
from jax.experimental.pallas import tpu as pltpu


# ----------------------------------------------------------------------------
# Lane-roll helper (with a tiny runtime probe for roll-direction semantics).
# ----------------------------------------------------------------------------
def _probe_roll_kernel(x_ref, o_ref):
    o_ref[...] = pltpu.roll(x_ref[...], shift=1, axis=1)


@functools.lru_cache(maxsize=None)
def _roll_mode():
    """+1: pltpu.roll matches jnp.roll; -1: opposite direction; 0: fallback."""
    try:
        x = jnp.broadcast_to(jnp.arange(128, dtype=jnp.float32), (8, 128))
        y = pl.pallas_call(
            _probe_roll_kernel,
            out_shape=jax.ShapeDtypeStruct((8, 128), jnp.float32))(x)
        v = float(y[0, 0])
        if v == 127.0:
            return 1
        if v == 1.0:
            return -1
        return 0
    except Exception:
        return 0


def _roll_lanes(v, k, mode):
    """jnp.roll semantics along the last axis: out[..., i] = v[..., (i - k) % n]."""
    n = v.shape[-1]
    k = k % n
    if k == 0:
        return v
    if mode == 1:
        return pltpu.roll(v, shift=k, axis=v.ndim - 1)
    if mode == -1:
        return pltpu.roll(v, shift=n - k, axis=v.ndim - 1)
    # Fallback: explicit slice + lane concat (always correct).
    return jnp.concatenate([v[..., n - k:], v[..., :n - k]], axis=-1)


# ----------------------------------------------------------------------------
# Layout helpers (pure glue): padded, flattened "(C, B*(H+2)*(W+2))" layout,
# lane dim padded up to a multiple of 128.
# ----------------------------------------------------------------------------
def _ppad(B, H, W):
    pp = B * (H + 2) * (W + 2)
    return -(-pp // 128) * 128


def pad_flat(x):
    """(C, B, H, W) -> (C, Ppad) zero-padded, centered, flat layout."""
    C, B, H, W = x.shape
    Hp, Wp = H + 2, W + 2
    xp = jnp.pad(x, ((0, 0), (0, 0), (1, 1), (1, 1)))
    xf = xp.reshape(C, B * Hp * Wp)
    ppad = _ppad(B, H, W)
    if ppad > B * Hp * Wp:
        xf = jnp.pad(xf, ((0, 0), (0, ppad - B * Hp * Wp)))
    return xf


def unflatten_center(xf, B, H, W):
    """(C, Ppad) -> (C, B, H, W) (drop padding ring + lane padding)."""
    C = xf.shape[0]
    Hp, Wp = H + 2, W + 2
    x = xf[:, :B * Hp * Wp].reshape(C, B, Hp, Wp)
    return x[:, :, 1:H + 1, 1:W + 1]


@functools.lru_cache(maxsize=None)
def _interior_mask(B, H, W):
    """(1, Ppad) f32: 1.0 at valid centered pixels, 0.0 at padding ring / lane pad."""
    Hp, Wp = H + 2, W + 2
    ppad = _ppad(B, H, W)
    m = np.zeros((Hp, Wp), np.float32)
    m[1:H + 1, 1:W + 1] = 1.0
    mf = np.tile(m.reshape(-1), B)
    mf = np.pad(mf, (0, ppad - B * Hp * Wp))
    return jnp.asarray(mf.reshape(1, ppad))


# ----------------------------------------------------------------------------
# Pallas kernels
# ----------------------------------------------------------------------------
def _make_dense_kernel(relu, has_add):
    """out(N, M) = W(N, K) @ X(K, M) + b(N, 1) [relu] [+ add(N, M)]."""
    if has_add:
        def kernel(w_ref, x_ref, b_ref, a_ref, o_ref):
            y = jnp.dot(w_ref[...], x_ref[...],
                        preferred_element_type=jnp.float32)
            y = y + b_ref[...]
            if relu:
                y = jnp.maximum(y, 0.0)
            y = y + a_ref[...]
            o_ref[...] = y.astype(o_ref.dtype)
    else:
        def kernel(w_ref, x_ref, b_ref, o_ref):
            y = jnp.dot(w_ref[...], x_ref[...],
                        preferred_element_type=jnp.float32)
            y = y + b_ref[...]
            if relu:
                y = jnp.maximum(y, 0.0)
            o_ref[...] = y.astype(o_ref.dtype)
    return kernel


def _make_convblock_kernel(n_chunks, Wp, mode):
    """Fused ConvBlock: relu(conv1(x)+b1) + emb, recenter+mask, relu(conv2+b2),
    recenter+mask.  Inputs/outputs use the padded flattened (C, Ppad) layout;
    each 3x3 tap is a lane roll by dy*Wp+dx feeding an MXU matmul."""
    def kernel(*refs):
        xs = refs[:n_chunks]
        w1s = refs[n_chunks:2 * n_chunks]
        b1_ref, eadd_ref, w2_ref, b2_ref, mask_ref = refs[2 * n_chunks:
                                                          2 * n_chunks + 5]
        o_ref = refs[-1]

        mask = mask_ref[...]
        xvals = [x[...] for x in xs]              # bf16, load once, roll in VMEM

        # ---- conv1 (accumulate 9 taps x n_chunks matmuls in f32) ----
        acc = None
        for dy in range(3):
            for dx in range(3):
                s = dy * Wp + dx
                for xv, w_ref in zip(xvals, w1s):
                    xt = _roll_lanes(xv, -s, mode)
                    d = jnp.dot(w_ref[dy * 3 + dx], xt,
                                preferred_element_type=jnp.float32)
                    acc = d if acc is None else acc + d
        h = jnp.maximum(acc + b1_ref[...], 0.0) + eadd_ref[...]
        # move values from "corner" to "centered" positions and zero the ring
        h = _roll_lanes(h, Wp + 1, mode) * mask
        hb = h.astype(jnp.bfloat16)

        # ---- conv2 ----
        acc2 = None
        for dy in range(3):
            for dx in range(3):
                s = dy * Wp + dx
                xt = _roll_lanes(hb, -s, mode)
                d = jnp.dot(w2_ref[dy * 3 + dx], xt,
                            preferred_element_type=jnp.float32)
                acc2 = d if acc2 is None else acc2 + d
        y = jnp.maximum(acc2 + b2_ref[...], 0.0)
        y = _roll_lanes(y, Wp + 1, mode) * mask
        o_ref[...] = y.astype(o_ref.dtype)
    return kernel


# ----------------------------------------------------------------------------
# pallas_call builders (cached so identical shapes reuse one compiled kernel).
# All arrays are tiny here, so each kernel uses whole-array VMEM blocks and no
# grid (grid=() -> one invocation, no serial grid-loop overhead).
# ----------------------------------------------------------------------------
@functools.lru_cache(maxsize=None)
def _build_dense(N, K, M, relu, has_add, out_dtype):
    return pl.pallas_call(
        _make_dense_kernel(relu, has_add),
        out_shape=jax.ShapeDtypeStruct((N, M), out_dtype))


@functools.lru_cache(maxsize=None)
def _build_convblock(chunk_cins, cout, B, H, W, mode):
    Wp = W + 2
    ppad = _ppad(B, H, W)
    return pl.pallas_call(
        _make_convblock_kernel(len(chunk_cins), Wp, mode),
        out_shape=jax.ShapeDtypeStruct((cout, ppad), jnp.bfloat16))


# ----------------------------------------------------------------------------
# Wrappers
# ----------------------------------------------------------------------------
def pallas_dense(w, x, b, relu=False, add=None, out_dtype=jnp.float32):
    """Transposed dense: out(N, M) = W(N, K) @ X(K, M) + b [relu] [+ add]."""
    N, K = w.shape
    M = x.shape[1]
    call = _build_dense(N, K, M, relu, add is not None, out_dtype)
    args = [w.astype(jnp.bfloat16), x.astype(jnp.bfloat16),
            b.reshape(N, 1).astype(jnp.float32)]
    if add is not None:
        args.append(add.astype(jnp.float32))
    return call(*args)


def pallas_conv_block(chunks, w1_chunks, b1, e_cb, w2, b2, B, H, W):
    """Fused ConvBlock.  chunks: list of (Ci, Ppad) bf16 padded-centered inputs;
    w1_chunks: matching list of (9, Cout, Ci); e_cb: (Cout, B) f32 emb values.
    Returns (Cout, Ppad) bf16, padded-centered."""
    Hp, Wp = H + 2, W + 2
    pp = B * Hp * Wp
    ppad = _ppad(B, H, W)
    cout = w2.shape[1]
    assert chunks[0].shape[1] == ppad

    call = _build_convblock(tuple(int(w.shape[2]) for w in w1_chunks),
                            cout, B, H, W, _roll_mode())
    # per-image emb add, broadcast over pixels (small; layout glue only)
    e_add = jnp.repeat(e_cb.astype(jnp.float32), Hp * Wp, axis=1)
    e_add = jnp.pad(e_add, ((0, 0), (0, ppad - pp)))
    mask = _interior_mask(B, H, W)

    args = ([c.astype(jnp.bfloat16) for c in chunks]
            + [w.astype(jnp.bfloat16) for w in w1_chunks]
            + [b1.reshape(cout, 1).astype(jnp.float32), e_add,
               w2.astype(jnp.bfloat16),
               b2.reshape(cout, 1).astype(jnp.float32), mask])
    return call(*args)


def pallas_conv_transpose2x2(xf, w_mat, b, B, H, W):
    """ConvTranspose2d(k=2, s=2).  xf: (Cin, Ppad) padded-centered at (H, W);
    w_mat: (4*Cout, Cin) with row index (i*2+j)*Cout+co.
    Returns ((Cout, Ppad2) padded-centered at (2H, 2W), 2H, 2W)."""
    Cout = w_mat.shape[0] // 4
    Hp, Wp = H + 2, W + 2
    b_full = jnp.tile(b.astype(jnp.float32), 4)
    y = pallas_dense(w_mat, xf, b_full, relu=False, out_dtype=jnp.bfloat16)
    # TODO(synk): the 2x2 interleave below is still an XLA transpose/copy outside
    # the kernel (lane-space stride-2 scatter has no clean Pallas equivalent here).
    t = y[:, :B * Hp * Wp].reshape(2, 2, Cout, B, Hp, Wp)[:, :, :, :,
                                                          1:H + 1, 1:W + 1]
    up = t.transpose(2, 3, 4, 0, 5, 1).reshape(Cout, B, 2 * H, 2 * W)
    return pad_flat(up), 2 * H, 2 * W


def maxpool2_glue(x):
    """MaxPool2d(2) on (C, B, H, W).  Pure layout glue (tiny tensors).
    TODO(synk): the stride-2 lane compaction is left to XLA; fusing it into the
    preceding ConvBlock kernel requires a lane gather with no cheap TPU form."""
    C, B, H, W = x.shape
    return jnp.max(x.reshape(C, B, H // 2, 2, W // 2, 2), axis=(3, 5))


# ----------------------------------------------------------------------------
# Model glue: sinusoidal embedding, parameter init, graph wiring.
# ----------------------------------------------------------------------------
def sinusoidal_emb(t, dim):
    half = dim // 2
    freq = jnp.exp(-jnp.arange(half, dtype=jnp.float32)
                   * (math.log(10000.0) / (half - 1)))
    scaled = t.astype(jnp.float32)[:, None] * freq[None, :]
    emb = jnp.concatenate([jnp.sin(scaled), jnp.cos(scaled)], axis=-1)
    if dim % 2 == 1:
        emb = jnp.concatenate(
            [emb, jnp.zeros((t.shape[0], 1), jnp.float32)], axis=-1)
    return emb


def _init_conv_block(key, cin, cout, emb_dim):
    ks = jax.random.split(key, 6)
    s1 = 1.0 / math.sqrt(cin * 9)
    s2 = 1.0 / math.sqrt(cout * 9)
    se = 1.0 / math.sqrt(emb_dim)
    bf = jnp.bfloat16
    return {
        # conv weights stored as (9, Cout, Cin), tap t = dy*3+dx
        "conv1_w": (jax.random.normal(ks[0], (9, cout, cin)) * s1).astype(bf),
        "conv1_b": jax.random.normal(ks[1], (cout,)) * s1,
        "conv2_w": (jax.random.normal(ks[2], (9, cout, cout)) * s2).astype(bf),
        "conv2_b": jax.random.normal(ks[3], (cout,)) * s2,
        # emb_proj weight in torch layout (out, in) = (Cout, emb_dim)
        "emb_w": (jax.random.normal(ks[4], (cout, emb_dim)) * se).astype(bf),
        "emb_b": jax.random.normal(ks[5], (cout,)) * se,
    }


def init_unet_params(key, in_channels, down_channels, up_channels,
                     time_emb_dim, num_classes):
    keys = iter(jax.random.split(key, 64))
    nk = lambda: next(keys)
    st = 1.0 / math.sqrt(time_emb_dim)
    bf = jnp.bfloat16
    p = {
        "time_l1_w": (jax.random.normal(nk(), (time_emb_dim, time_emb_dim)) * st).astype(bf),
        "time_l1_b": jax.random.normal(nk(), (time_emb_dim,)) * st,
        "time_l2_w": (jax.random.normal(nk(), (time_emb_dim, time_emb_dim)) * st).astype(bf),
        "time_l2_b": jax.random.normal(nk(), (time_emb_dim,)) * st,
        "class_emb": jax.random.normal(nk(), (num_classes, time_emb_dim)),
    }
    downs, prev = [], in_channels
    for ch in down_channels:
        downs.append(_init_conv_block(nk(), prev, ch, time_emb_dim))
        prev = ch
    p["downs"] = downs
    p["bottleneck"] = _init_conv_block(nk(), prev, prev, time_emb_dim)
    ups = []
    for idx, ch in enumerate(up_channels):
        skip_ch = down_channels[-(idx + 1)]
        su = 1.0 / math.sqrt(prev * 4)
        ups.append({
            # (4*Cout, Cin), row index (i*2+j)*Cout + co
            "upconv_w": (jax.random.normal(nk(), (4 * ch, prev)) * su).astype(bf),
            "upconv_b": jax.random.normal(nk(), (ch,)) * su,
            "convblock": _init_conv_block(nk(), ch + skip_ch, ch, time_emb_dim),
        })
        prev = ch
    so = 1.0 / math.sqrt(prev)
    p["out_w"] = (jax.random.normal(nk(), (in_channels, prev)) * so).astype(bf)
    p["out_b"] = jax.random.normal(nk(), (in_channels,)) * so
    p["ups"] = ups          # <-- bug fix: this assignment was missing before
    return p


def unet_forward(params, x_nchw, timestep, label, time_emb_dim):
    B, C0, H0, W0 = x_nchw.shape

    # ---- time / class embedding (transposed (T, B) form, relu-then-add) ----
    t = sinusoidal_emb(timestep, time_emb_dim)                     # (B, T) f32
    h1 = pallas_dense(params["time_l1_w"], t.T, params["time_l1_b"],
                      relu=True, out_dtype=jnp.bfloat16)           # (T, B)
    l_emb = jnp.take(params["class_emb"], label, axis=0).T         # (T, B) glue
    emb = pallas_dense(params["time_l2_w"], h1, params["time_l2_b"],
                       relu=True, add=l_emb, out_dtype=jnp.bfloat16)  # (T, B)

    # ---- NCHW -> (C, B, H, W) -> padded flat bf16 ----
    x = jnp.transpose(x_nchw, (1, 0, 2, 3)).astype(jnp.bfloat16)
    cur = pad_flat(x)
    curH, curW = H0, W0

    skips = []
    for bp in params["downs"]:
        e_cb = pallas_dense(bp["emb_w"], emb, bp["emb_b"], relu=False)  # (Cout, B)
        out = pallas_conv_block([cur], [bp["conv1_w"]], bp["conv1_b"], e_cb,
                                bp["conv2_w"], bp["conv2_b"], B, curH, curW)
        skips.append((out, curH, curW))
        pooled = maxpool2_glue(unflatten_center(out, B, curH, curW))
        curH, curW = curH // 2, curW // 2
        cur = pad_flat(pooled)

    bp = params["bottleneck"]
    e_cb = pallas_dense(bp["emb_w"], emb, bp["emb_b"], relu=False)
    cur = pallas_conv_block([cur], [bp["conv1_w"]], bp["conv1_b"], e_cb,
                            bp["conv2_w"], bp["conv2_b"], B, curH, curW)

    for idx, up in enumerate(params["ups"]):
        cur, curH, curW = pallas_conv_transpose2x2(
            cur, up["upconv_w"], up["upconv_b"], B, curH, curW)
        skip_flat, sH, sW = skips[-(idx + 1)]
        assert (sH, sW) == (curH, curW)
        cb = up["convblock"]
        ch = up["upconv_w"].shape[0] // 4
        w1 = cb["conv1_w"]                    # (9, Cout, ch + skip_ch)
        e_cb = pallas_dense(cb["emb_w"], emb, cb["emb_b"], relu=False)
        # skip-concat avoided: two chunks accumulated inside one kernel
        cur = pallas_conv_block([cur, skip_flat],
                                [w1[:, :, :ch], w1[:, :, ch:]],
                                cb["conv1_b"], e_cb,
                                cb["conv2_w"], cb["conv2_b"], B, curH, curW)

    of = pallas_dense(params["out_w"], cur, params["out_b"],
                      relu=False, out_dtype=jnp.float32)           # (C0, Ppad)
    out = unflatten_center(of, B, curH, curW)                      # (C0, B, H, W)
    return jnp.transpose(out, (1, 0, 2, 3))                        # NCHW


if __name__ == "__main__":
    key = jax.random.PRNGKey(0)
    in_channels = 4
    down_channels = [8, 16, 16]
    up_channels = [16, 16, 8]
    time_emb_dim = 16
    num_classes = 10
    B, H, W = 2, 16, 16

    kp, kx, kt, kl = jax.random.split(key, 4)
    params = init_unet_params(kp, in_channels, down_channels, up_channels,
                              time_emb_dim, num_classes)
    x = jax.random.normal(kx, (B, in_channels, H, W), jnp.float32)
    timestep = jax.random.randint(kt, (B,), 0, 1000).astype(jnp.float32)
    label = jax.random.randint(kl, (B,), 0, num_classes)

    out = unet_forward(params, x, timestep, label, time_emb_dim)
    out = jax.block_until_ready(out)
    assert out.shape == (B, in_channels, H, W), out.shape
    assert bool(jnp.all(jnp.isfinite(out)))
    print("KERNEL_OK")
</pallas_src>

<mosaic_0001>
module attributes {stable_mosaic.version = 11 : i64} {
  func.func @kernel(%arg0: memref<16x16xbf16, #tpu.memory_space<vmem>>, %arg1: memref<16x2xbf16, #tpu.memory_space<vmem>>, %arg2: memref<16x1xf32, #tpu.memory_space<vmem>>, %arg3: memref<16x2xbf16, #tpu.memory_space<vmem>>) attributes {dimension_semantics = [], scalar_prefetch = 0 : i64, scratch_operands = 0 : i64, tpu.core_type = #tpu.core_type<tc>} {
    %c0 = arith.constant 0 : index
    %c0_0 = arith.constant 0 : index
    %0 = vector.load %arg0[%c0, %c0_0] : memref<16x16xbf16, #tpu.memory_space<vmem>>, vector<16x16xbf16>
    %c0_1 = arith.constant 0 : index
    %c0_2 = arith.constant 0 : index
    %1 = vector.load %arg1[%c0_1, %c0_2] : memref<16x2xbf16, #tpu.memory_space<vmem>>, vector<16x2xbf16>
    %cst = arith.constant dense<0.000000e+00> : vector<16x2xf32>
    %2 = tpu.matmul %0, %1, %cst {dimension_numbers = #tpu.dot_dimension_numbers<[1], [0], [0], [1], [0, 0, 1, 1], [], []>} : vector<16x16xbf16>, vector<16x2xbf16>, vector<16x2xf32> -> vector<16x2xf32>
    %c0_3 = arith.constant 0 : index
    %c0_4 = arith.constant 0 : index
    %3 = vector.load %arg2[%c0_3, %c0_4] : memref<16x1xf32, #tpu.memory_space<vmem>>, vector<16x1xf32>
    %4 = vector.broadcast %3 : vector<16x1xf32> to vector<16x2xf32>
    %5 = arith.addf %2, %4 : vector<16x2xf32>
    %cst_5 = arith.constant 0.000000e+00 : f32
    %6 = vector.broadcast %cst_5 : f32 to vector<16x2xf32>
    %7 = arith.maximumf %5, %6 : vector<16x2xf32>
    %8 = arith.truncf %7 : vector<16x2xf32> to vector<16x2xbf16>
    %c0_6 = arith.constant 0 : index
    %c0_7 = arith.constant 0 : index
    %9 = vector.load %arg3[%c0_6, %c0_7] : memref<16x2xbf16, #tpu.memory_space<vmem>>, vector<16x2xbf16>
    tpu.vector_store %arg3[%c0_6, %c0_7], %8 {strides = array<i32>} : memref<16x2xbf16, #tpu.memory_space<vmem>>, vector<16x2xbf16>,
    return
  }
}

</mosaic_0001>

<bundles_post_ra>
// kernel: tpu_custom_call.1
= control target key start
LH: loop header
LB: loop body
LE: loop exit
PB: predicated region body
PF: predicated region fallthrough
CT: control target
= control target key end

     0   :  { %v125_v0 = vmov 0.0   ;;  %vm126_vm0 = vmmov 0   ;;  %v127_v3 = vmov 0   ;;  %vm42_vm1 = vcmask 130048   ;;  %s166_s1 = inlined_call_operand.vmem [shape: bf16[16,2], index: 1, kind: input, shape index: {}]   ;;  %s167_s0 = inlined_call_operand.vmem [shape: bf16[16,16], index: 0, kind: input, shape index: {}]   ;;  %s168_s2 = inlined_call_operand.vmem [shape: f32[16,1], index: 2, kind: input, shape index: {}]   ;;  %s169_s3 = inlined_call_operand.vmem [shape: bf16[16,2], index: 3, kind: output, shape index: {}]  }
   0x1   :  { %113 = vmatprep.subr.bf16.mxu0 %v125_v0  ;;  %v123_v1 = vld [vmem:[%s166_s1] sm:$0xff]   ;;  %115 = vmatprep.mubr.msk.bf16.mxu0 %vm126_vm0, %v125_v0  ;;  %v20_v5 = vld [vmem:[%s168_s2 + $0x8] sm:$0xff]  ;;  %vm97_vm2 = vcmask 11264  }
   0x2   :  { %v124_v2 = vld [vmem:[%s167_s0] sm:$0xff]   ;;  %122 = vset.pattern.permute.xlu0 %v127_v3  ;;  %114 = vmatpush3.bf16.msra.mxu0 %v123_v1 }
   0x3   :  { %v19_v4 = vld [vmem:[%s168_s2] sm:$0xff] }
   0x4   :  { %23 = vperm.xlu0 %122, %v19_v4  }
   0x5   :  { %116 = vmatmul.mubr.msk.bf16.vlgmr.msra.gmra.mrb[0].mxu0 %vm42_vm1, %v124_v2 }
   0x8   :  { %28 = vperm.xlu0 %122, %v20_v5  }
  0x83   :  { %v24_v6 = vpop.permute.xlu0 %23 }
  0x87   :  { %v29_v10 = vpop.permute.xlu0 %28 }
  0xd8   :  { %v80_v7 = vpop.f32.mrb[0].mxu0 }
  0xd9   :  { %v81_v8 = vadd.f32 %v80_v7, %v24_v6  ;;  %v117_v9 = vpop.f32.mrb[1].mxu0 }
  0xda   :  { %v83_v11 = vpop.f32.mrb[2].mxu0 }
  0xdb   :  { %v87_v12 = vmax.f32 %v81_v8, 0.0  ;;  %v84_v13 = vadd.f32 %v83_v11, %v29_v10  ;;  %v118_v14 = vpop.f32.mrb[3].mxu0 }
  0xdd   :  { %v109_v15 = vpack.c.bf16 %v87_v12, %v87_v12  ;;  %v88_v16 = vmax.f32 %v84_v13, 0.0 }
  0xdf   :  { %98 = vst.msk [vmem:[%s169_s3] sm:$0xf] %vm97_vm2, %v109_v15  ;;  %v110_v17 = vpack.c.bf16 %v88_v16, %v88_v16 }
  0xe1   :  { %99 = vst.msk [vmem:[%s169_s3 + $0x4] sm:$0xf] %vm97_vm2, %v110_v17 }

</bundles_post_ra>
